<compile_context>
chip_gen: v5e
topology: v5e:2x2
jax: 0.10.0
libtpu: 0.0.40
codegen_flags: <defaults>
</compile_context>

<pallas_src>
import math

import jax
import jax.numpy as jnp
from jax.experimental import pallas as pl
from jax.experimental.pallas import tpu as pltpu


_NEG_BIG = -1e30  # bias for padded class lanes: exp underflows to exactly 0


def _round_up(x, m):
    return ((x + m - 1) // m) * m


def _fc_logsoftmax(x, w_ref, b_ref, o_ref):
    """x @ W + b followed by log_softmax along the (padded) class axis."""
    w = w_ref[...].astype(jnp.float32)                       # (H, C_pad)
    b = b_ref[...].astype(jnp.float32)                       # (1, C_pad)
    logits = jnp.dot(x, w, preferred_element_type=jnp.float32) + b
    m = jnp.max(logits, axis=-1, keepdims=True)
    z = logits - m
    lse = jnp.log(jnp.sum(jnp.exp(z), axis=-1, keepdims=True))
    o_ref[...] = (z - lse).astype(o_ref.dtype)


def _ctc_eval_kernel(x_ref, w_ref, b_ref, o_ref):
    _fc_logsoftmax(x_ref[...].astype(jnp.float32), w_ref, b_ref, o_ref)


def _ctc_train_kernel(x_ref, mask_ref, w_ref, b_ref, o_ref):
    # mask already carries the 1/(1-p) scale (inverted dropout), 0 for dropped.
    x = x_ref[...].astype(jnp.float32) * mask_ref[...]
    _fc_logsoftmax(x, w_ref, b_ref, o_ref)


def ctc_decoder_forward(listener_outputs, weight, bias, *,
                        dropout_p=0.5, training=False, rng_key=None,
                        tile_rows=512):
    """Pallas implementation of CTCDecoder.forward.

    listener_outputs: (B, T, H) float32
    weight:           (H, C)    float32   (torch Linear weight transposed)
    bias:             (C,)      float32
    returns log_probs (B, T, C) float32
    """
    B, T, H = listener_outputs.shape
    C = weight.shape[1]
    rows = B * T

    # ---- lane-dense class padding -------------------------------------------
    C_pad = _round_up(C, 128)
    if C_pad != C:
        weight = jnp.pad(weight, ((0, 0), (0, C_pad - C)))
        bias = jnp.concatenate(
            [bias, jnp.full((C_pad - C,), _NEG_BIG, dtype=bias.dtype)])
    b2 = bias.reshape(1, C_pad)

    # ---- row tiling: big tiles, pad tail instead of asserting ---------------
    tile_rows = max(8, min(int(tile_rows), _round_up(rows, 8)))
    tile_rows = _round_up(tile_rows, 8)
    rows_p = _round_up(rows, tile_rows)

    x = listener_outputs.reshape(rows, H)
    if rows_p != rows:
        x = jnp.pad(x, ((0, rows_p - rows), (0, 0)))

    in_arrays = [x]
    in_specs = [pl.BlockSpec((tile_rows, H), lambda i: (i, 0))]

    if training and dropout_p > 0.0:
        if rng_key is None:
            rng_key = jax.random.PRNGKey(0)
        if dropout_p >= 1.0:
            # torch: Dropout(p=1) zeroes everything -> logits == bias.
            mask = jnp.zeros((rows_p, H), jnp.float32)
        else:
            keep = jax.random.bernoulli(rng_key, 1.0 - dropout_p, (rows_p, H))
            mask = keep.astype(jnp.float32) * jnp.float32(1.0 / (1.0 - dropout_p))
        in_arrays.append(mask)
        in_specs.append(pl.BlockSpec((tile_rows, H), lambda i: (i, 0)))
        kernel = _ctc_train_kernel
    else:
        kernel = _ctc_eval_kernel

    # Weight / bias: constant block index -> DMA'd once, resident in VMEM.
    in_arrays += [weight, b2]
    in_specs += [pl.BlockSpec((H, C_pad), lambda i: (0, 0)),
                 pl.BlockSpec((1, C_pad), lambda i: (0, 0))]

    out = pl.pallas_call(
        kernel,
        out_shape=jax.ShapeDtypeStruct((rows_p, C_pad), jnp.float32),
        grid=(rows_p // tile_rows,),
        in_specs=in_specs,
        out_specs=pl.BlockSpec((tile_rows, C_pad), lambda i: (i, 0)),
        compiler_params=pltpu.CompilerParams(
            dimension_semantics=("parallel",)),   # independent row tiles
    )(*in_arrays)

    return out[:rows, :C].reshape(B, T, C)


def _reference_forward(listener_outputs, weight, bias):
    """Pure-JAX reference for the eval path (dropout = identity)."""
    logits = jnp.einsum("bth,hc->btc", listener_outputs, weight) + bias
    return jax.nn.log_softmax(logits, axis=2)


if __name__ == "__main__":
    # Small shapes consistent with the module: batch=2, maxlen=8, hidden=32, classes=16
    B, T, H, C = 2, 8, 32, 16

    key = jax.random.PRNGKey(0)
    kx, kw, kb, kd = jax.random.split(key, 4)

    listener_outputs = jax.random.normal(kx, (B, T, H), dtype=jnp.float32)

    # Deterministic init mirroring nn.Linear: U(-1/sqrt(H), 1/sqrt(H))
    bound = 1.0 / math.sqrt(H)
    weight = jax.random.uniform(kw, (H, C), minval=-bound, maxval=bound,
                                dtype=jnp.float32)
    bias = jax.random.uniform(kb, (C,), minval=-bound, maxval=bound,
                              dtype=jnp.float32)

    # Eval path (dropout disabled) -- deterministic, check against reference.
    log_probs = ctc_decoder_forward(listener_outputs, weight, bias,
                                    dropout_p=0.5, training=False)
    jax.block_until_ready(log_probs)
    ref = _reference_forward(listener_outputs, weight, bias)
    assert log_probs.shape == (B, T, C)
    assert jnp.allclose(log_probs, ref, atol=1e-5, rtol=1e-5), "mismatch vs reference"

    # Training path (inverted-dropout mask applied inside the kernel).
    log_probs_train = ctc_decoder_forward(listener_outputs, weight, bias,
                                          dropout_p=0.5, training=True,
                                          rng_key=kd)
    jax.block_until_ready(log_probs_train)
    assert log_probs_train.shape == (B, T, C)
    assert jnp.all(jnp.isfinite(log_probs_train))
    # Rows of log-probs must still normalize to 1.
    assert jnp.allclose(jnp.sum(jnp.exp(log_probs_train), axis=2), 1.0, atol=1e-4)

    print("KERNEL_OK")
</pallas_src>

<mosaic_0001>
module attributes {stable_mosaic.version = 11 : i64} {
  func.func @_ctc_eval_kernel(%arg0: i32, %arg1: memref<16x32xf32, #tpu.memory_space<vmem>>, %arg2: memref<32x128xf32, #tpu.memory_space<vmem>>, %arg3: memref<1x128xf32, #tpu.memory_space<vmem>>, %arg4: memref<16x128xf32, #tpu.memory_space<vmem>>) attributes {dimension_semantics = [#tpu.dimension_semantics<parallel>], iteration_bounds = array<i64: 1>, scalar_prefetch = 0 : i64, scratch_operands = 0 : i64, tpu.core_type = #tpu.core_type<tc>, window_params = [{transform_indices = @transform_0, window_bounds = array<i64: 16, 32>}, {pipeline_mode = #tpu.pipeline_mode<synchronous>, transform_indices = @transform_1, window_bounds = array<i64: 32, 128>}, {pipeline_mode = #tpu.pipeline_mode<synchronous>, transform_indices = @transform_2, window_bounds = array<i64: 1, 128>}, {transform_indices = @transform_3, window_bounds = array<i64: 16, 128>}]} {
    %c0 = arith.constant 0 : index
    %c0_0 = arith.constant 0 : index
    %0 = vector.load %arg1[%c0, %c0_0] : memref<16x32xf32, #tpu.memory_space<vmem>>, vector<16x32xf32>
    %c0_1 = arith.constant 0 : index
    %c0_2 = arith.constant 0 : index
    %1 = vector.load %arg2[%c0_1, %c0_2] : memref<32x128xf32, #tpu.memory_space<vmem>>, vector<32x128xf32>
    %c0_3 = arith.constant 0 : index
    %c0_4 = arith.constant 0 : index
    %2 = vector.load %arg3[%c0_3, %c0_4] : memref<1x128xf32, #tpu.memory_space<vmem>>, vector<1x128xf32>
    %cst = arith.constant dense<0.000000e+00> : vector<16x128xf32>
    %3 = tpu.matmul %0, %1, %cst {dimension_numbers = #tpu.dot_dimension_numbers<[1], [0], [0], [1], [0, 0, 1, 1], [], []>} : vector<16x32xf32>, vector<32x128xf32>, vector<16x128xf32> -> vector<16x128xf32>
    %4 = vector.broadcast %2 : vector<1x128xf32> to vector<16x128xf32>
    %5 = arith.addf %3, %4 : vector<16x128xf32>
    %cst_5 = arith.constant dense<0xFF800000> : vector<16xf32>
    %6 = vector.multi_reduction <maximumf>, %5, %cst_5 [1] : vector<16x128xf32> to vector<16xf32>
    %7 = vector.shape_cast %6 : vector<16xf32> to vector<16x1xf32>
    %8 = vector.broadcast %7 : vector<16x1xf32> to vector<16x128xf32>
    %9 = arith.subf %5, %8 : vector<16x128xf32>
    %10 = math.exp %9 : vector<16x128xf32>
    %cst_6 = arith.constant dense<0.000000e+00> : vector<16xf32>
    %11 = vector.multi_reduction <add>, %10, %cst_6 [1] : vector<16x128xf32> to vector<16xf32>
    %12 = vector.shape_cast %11 : vector<16xf32> to vector<16x1xf32>
    %13 = math.log %12 : vector<16x1xf32>
    %14 = vector.broadcast %13 : vector<16x1xf32> to vector<16x128xf32>
    %15 = arith.subf %9, %14 : vector<16x128xf32>
    %c0_7 = arith.constant 0 : index
    %c0_8 = arith.constant 0 : index
    %16 = vector.load %arg4[%c0_7, %c0_8] : memref<16x128xf32, #tpu.memory_space<vmem>>, vector<16x128xf32>
    tpu.vector_store %arg4[%c0_7, %c0_8], %15 {strides = array<i32>} : memref<16x128xf32, #tpu.memory_space<vmem>>, vector<16x128xf32>,
    return
  }
  func.func @transform_0(%arg0: i32) -> (i32, i32) {
    %c0_i32 = arith.constant 0 : i32
    %c0_i32_0 = arith.constant 0 : i32
    return %arg0, %c0_i32 : i32, i32
  }
  func.func @transform_1(%arg0: i32) -> (i32, i32) {
    %c0_i32 = arith.constant 0 : i32
    %c0_i32_0 = arith.constant 0 : i32
    %c0_i32_1 = arith.constant 0 : i32
    return %c0_i32, %c0_i32_0 : i32, i32
  }
  func.func @transform_2(%arg0: i32) -> (i32, i32) {
    %c0_i32 = arith.constant 0 : i32
    %c0_i32_0 = arith.constant 0 : i32
    %c0_i32_1 = arith.constant 0 : i32
    return %c0_i32, %c0_i32_0 : i32, i32
  }
  func.func @transform_3(%arg0: i32) -> (i32, i32) {
    %c0_i32 = arith.constant 0 : i32
    %c0_i32_0 = arith.constant 0 : i32
    return %arg0, %c0_i32 : i32, i32
  }
}

</mosaic_0001>

<bundles_post_ra>
// kernel: tpu_custom_call.1
= control target key start
LH: loop header
LB: loop body
LE: loop exit
PB: predicated region body
PF: predicated region fallthrough
CT: control target
= control target key end

     0   :  { %8 = vsyncpa [#allocation3], 0  ;;  %s273_s0 = inlined_call_operand.hbm [shape: f32[16,32], index: 0, kind: input, shape index: {}]   ;;  %s274_s1 = inlined_call_operand.hbm [shape: f32[32,128], index: 1, kind: input, shape index: {}]   ;;  %s275_s2 = inlined_call_operand.vmem [shape: f32[1,128], index: 2, kind: input, shape index: {}]   ;;  %s276_s3 = inlined_call_operand.hbm [shape: f32[16,128], index: 3, kind: output, shape index: {}]  }
   0x1   :  { %9 = vsyncpa [#allocation6], 0 }
   0x2   :  { %10 = vsyncpa [#allocation4], 0  ;;  %s15_s14 = sshll.u32 %s273_s0, 4  ;;  %s227_s15 = smov [#allocation2]   ;;  %s16_s14 = int_to_ptr.hbm [resolvable:$true] %s15_s14 }
   0x3   :  { %s17_s16 = sshll.u32 %s227_s15, 4  ;;  %s28_s19 = sshll.u32 %s274_s1, 4  ;;  %s18_s16 = int_to_ptr.vmem [resolvable:$true] %s17_s16  ;;  %s29_s19 = int_to_ptr.hbm [resolvable:$true] %s28_s19 }
   0x4   :  { %s228_s20 = smov 128   ;;  %s229_s21 = smov 8  }
   0x5   :  { %23 = dma.hbm_to_vmem [thread:$0]  %s16_s14, 256, %s18_s16, [#allocation3], %s228_s20, %s228_s20, %s229_s21  }
   0x6   :  { %s230_s22 = smov [#allocation5]  }
   0x7   :  { %s30_s23 = sshll.u32 %s230_s22, 4  ;;  %s31_s23 = int_to_ptr.vmem [resolvable:$true] %s30_s23 }
   0x8   :  { %36 = dma.hbm_to_vmem [thread:$0]  %s29_s19, 512, %s31_s23, [#allocation6], %s228_s20, %s228_s20, %s229_s21  }
   0x9   :  { %221 = dma.done.wait [#allocation3], 256  }
   0xa   :  { %222 = vsyncadd [#allocation3], 4294967040 }
   0xb   :  { %223 = dma.done.wait [#allocation6], 512  }
   0xc   :  { %224 = vsyncadd [#allocation6], 4294966784  ;;  %v52_v0 = vld [vmem:[#allocation5 + $0x18] sm:$0xff]  ;;  %v51_v1 = vld [vmem:[#allocation5 + $0x10] sm:$0xff]  ;;  %vm57_vm0 = vcmask 261120   ;;  %s115_s27 = sshll.u32 %s276_s3, 4  ;;  %s116_s27 = int_to_ptr.hbm [resolvable:$true] %s115_s27 }
   0xd   :  { %76 = vmatpush.msra.mxu0 %v52_v0  ;;  %131 = vmatpush.msra.mxu1 %v52_v0  ;;  %v50_v2 = vld [vmem:[#allocation5 + $0x8] sm:$0xff]  ;;  %v49_v3 = vld [vmem:[#allocation5] sm:$0xff]  ;;  %v47_v4 = vld [vmem:[#allocation2] sm:$0xff] }
   0xe   :  { %v48_v5 = vld [vmem:[#allocation2 + $0x8] sm:$0xff]  ;;  %v140_v6 = vld [vmem:[%s275_s2] ss:$0 sm:$0xff]  ;;  %s231_s2 = smov [#allocation7]  }
   0xf   :  { %77 = vmatpush.msra.mxu0 %v51_v1  ;;  %132 = vmatpush.msra.mxu1 %v51_v1  ;;  %s113_s24 = sshll.u32 %s231_s2, 4  ;;  %s114_s24 = int_to_ptr.vmem [resolvable:$true] %s113_s24 }
  0x11   :  { %78 = vmatpush.msra.mxu0 %v50_v2  ;;  %133 = vmatpush.msra.mxu1 %v50_v2 }
  0x13   :  { %79 = vmatpush.msra.mxu0 %v49_v3  ;;  %134 = vmatpush.msra.mxu1 %v49_v3 }
  0x14   :  { %129 = vmatmul.msk.f32.vlgmr.msra.gmra.mxu0 %vm57_vm0, %v47_v4  ;;  %130 = vmatmul.msk.f32.vlgmr.msra.gmra.mxu1 %vm57_vm0, %v48_v5 }
  0x91   :  { %v81_v7 = vpop.f32.mrf.mxu0  ;;  %v84_v9 = vpop.f32.mrf.mxu1 }
  0x92   :  { %v82_v8 = vadd.f32 %v140_v6, %v81_v7  ;;  %v85_v10 = vadd.f32 %v140_v6, %v84_v9 }
  0x94   :  { %87 = vmax.xlane.f32.xlu0 %v82_v8 }
  0x9c   :  { %89 = vmax.xlane.f32.xlu0 %v85_v10 }
 0x107   :  { %v88_v11 = vpop.xlane.xlu0 %87 }
 0x108   :  { %v91_v12 = vsub.f32 %v82_v8, %v88_v11 }
 0x10a   :  { %v93_v13 = vmul.f32 1.442695, %v91_v12 }
 0x10c   :  { %141 = vpow2.f32 %v93_v13 }
 0x10f   :  { %v90_v14 = vpop.xlane.xlu0 %89 }
 0x110   :  { %v92_v15 = vsub.f32 %v85_v10, %v90_v14 }
 0x112   :  { %v142_v16 = vpop.eup %141  ;;  %v95_v17 = vmul.f32 1.442695, %v92_v15 }
 0x113   :  { %97 = vadd.xlane.f32.xlu1 %v142_v16 }
 0x114   :  { %143 = vpow2.f32 %v95_v17 }
 0x11a   :  { %v144_v18 = vpop.eup %143 }
 0x11b   :  { %99 = vadd.xlane.f32.xlu1 %v144_v18 }
 0x186   :  { %v98_v19 = vpop.xlane.xlu1 %97 }
 0x187   :  { %145 = vlog2.f32 %v98_v19 }
 0x18d   :  { %v146_v20 = vpop.eup %145 }
 0x18e   :  { %v102_v21 = vmul.f32 0.6931472, %v146_v20  ;;  %v100_v22 = vpop.xlane.xlu1 %99 }
 0x18f   :  { %147 = vlog2.f32 %v100_v22 }
 0x190   :  { %v105_v23 = vsub.f32 %v91_v12, %v102_v21 }
 0x192   :  { %107 = vst [vmem:[#allocation7] sm:$0xff] %v105_v23 }
 0x195   :  { %v148_v24 = vpop.eup %147 }
 0x196   :  { %v104_v25 = vmul.f32 0.6931472, %v148_v24 }
 0x198   :  { %v106_v26 = vsub.f32 %v92_v15, %v104_v25 }
 0x19a   :  { %108 = vst [vmem:[#allocation7 + $0x8] sm:$0xff] %v106_v26 }
 0x19b   :  { %121 = dma.vmem_to_hbm [thread:$0]  %s114_s24, 256, %s116_s27, [#allocation4], %s228_s20, %s228_s20, %s229_s21  }
 0x19c   :  { %225 = dma.done.wait [#allocation4], 256  }
 0x19d   :  { %226 = vsyncadd [#allocation4], 4294967040 }
 0x19e   :  { %126 = vsyncpa [#allocation3], 1 }
 0x19f   :  { %127 = vsyncpa [#allocation6], 1 }
 0x1a0   :  { %128 = vsyncpa [#allocation4], 1 }

</bundles_post_ra>
